<compile_context>
chip_gen: v6e
topology: v6e:2x2x1
jax: 0.10.0
libtpu: 0.0.40
codegen_flags: <defaults>
</compile_context>

<pallas_src>
import functools

import jax
import jax.numpy as jnp
from jax.experimental import pallas as pl
from jax.experimental.pallas import tpu as pltpu


def _score_tile_and_mask(dcol_ref, drow_ref, im_ref, s_ref, *, n_valid, n_pad, tm, tn):
    """Shared per-tile work: score tile, hinge arguments, dead-cell mask."""
    i = pl.program_id(0)
    j = pl.program_id(1)

    # scores[a, b] = <im_row_tile[a], s_col_tile[b]>  ('nt' matmul, f32 accumulate)
    scores = jax.lax.dot_general(
        im_ref[...], s_ref[...],
        dimension_numbers=(((1,), (1,)), ((), ())),
        preferred_element_type=jnp.float32)                      # (tm, tn)

    cs = scores - dcol_ref[...]     # anchored on the row's positive pair   (d1)
    ci = scores - drow_ref[...]     # anchored on the column's positive pair (d2)

    row_ids = i * tm + jax.lax.broadcasted_iota(jnp.int32, (tm, tn), 0)
    col_ids = j * tn + jax.lax.broadcasted_iota(jnp.int32, (tm, tn), 1)
    dead = row_ids == col_ids                                    # diagonal cells
    if n_valid != n_pad:                                         # static: only if padded
        dead = dead | (row_ids >= n_valid) | (col_ids >= n_valid)
    return cs, ci, dead


def _vse_sum_kernel(dcol_ref, drow_ref, im_ref, s_ref, out_ref, *,
                    margin, n_valid, n_pad, tm, tn):
    """Sum-over-all-negatives objective: per-row-tile partial sums."""
    j = pl.program_id(1)

    @pl.when(j == 0)
    def _init():
        out_ref[...] = jnp.zeros_like(out_ref)

    cs, ci, dead = _score_tile_and_mask(
        dcol_ref, drow_ref, im_ref, s_ref,
        n_valid=n_valid, n_pad=n_pad, tm=tm, tn=tn)

    half_m = jnp.float32(0.5 * margin)
    full_m = jnp.float32(margin)
    # sum of the four hinge costs; a single mask-select is equivalent to masking each.
    combined = (jnp.maximum(cs + half_m, 0.0) + jnp.maximum(cs + full_m, 0.0) +
                jnp.maximum(ci + half_m, 0.0) + jnp.maximum(ci + full_m, 0.0))
    combined = jnp.where(dead, 0.0, combined)

    out_ref[...] += jnp.sum(combined, axis=1, keepdims=True)     # (tm, 1)


def _vse_max_kernel(dcol_ref, drow_ref, im_ref, s_ref,
                    rmax_org_ref, rmax_mix_ref, cmax_org_ref, cmax_mix_ref, *,
                    margin, n_valid, n_pad, tm, tn):
    """VSE++ (max_violation) objective: running row maxima + per-tile column maxima."""
    j = pl.program_id(1)

    @pl.when(j == 0)
    def _init():
        rmax_org_ref[...] = jnp.zeros_like(rmax_org_ref)   # costs are >= 0
        rmax_mix_ref[...] = jnp.zeros_like(rmax_mix_ref)

    cs, ci, dead = _score_tile_and_mask(
        dcol_ref, drow_ref, im_ref, s_ref,
        n_valid=n_valid, n_pad=n_pad, tm=tm, tn=tn)

    half_m = jnp.float32(0.5 * margin)
    full_m = jnp.float32(margin)
    cost_s_org = jnp.where(dead, 0.0, jnp.maximum(cs + full_m, 0.0))
    cost_s_mix = jnp.where(dead, 0.0, jnp.maximum(cs + half_m, 0.0))
    cost_im_org = jnp.where(dead, 0.0, jnp.maximum(ci + full_m, 0.0))
    cost_im_mix = jnp.where(dead, 0.0, jnp.maximum(ci + half_m, 0.0))

    # running max over the column-tile sweep (axis=1 lane reduce per tile)
    rmax_org_ref[...] = jnp.maximum(rmax_org_ref[...],
                                    jnp.max(cost_s_org, axis=1, keepdims=True))
    rmax_mix_ref[...] = jnp.maximum(rmax_mix_ref[...],
                                    jnp.max(cost_s_mix, axis=1, keepdims=True))

    # per-tile column maxima; the wrapper reduces over the row-tile axis
    cmax_org_ref[...] = jnp.max(cost_im_org, axis=0, keepdims=True).reshape(1, 1, tn)
    cmax_mix_ref[...] = jnp.max(cost_im_mix, axis=0, keepdims=True).reshape(1, 1, tn)


def contrastive_loss_mixup(im, s, lam1=None, lam2=None, *, margin=0.0,
                           max_violation=False, tile=128):
    """Forward of ContrastiveLoss_mixup.  im, s: (N, D).

    lam1/lam2 (the Beta(1,1) mixup coefficients) are accepted for API parity but do
    not affect the forward value: the replaced diagonal entries are masked to zero
    before any reduction, exactly as in the PyTorch module.
    """
    del lam1, lam2  # mixup branch is dead in the forward output (see module analysis)
    n, d = im.shape
    assert s.shape == (n, d)
    margin = float(margin)

    # --- tiling: full-array block for small N, otherwise 128x128 score tiles
    # (sized so im/s/diag blocks fit comfortably in v7x's smaller VMEM as well).
    if n <= tile:
        tm = tn = n
        n_pad = n
    else:
        tm = tn = tile
        n_pad = ((n + tile - 1) // tile) * tile

    # diagonal of im @ s.T computed directly (no NxN mask / reduce)
    diag = jnp.sum(im.astype(jnp.float32) * s.astype(jnp.float32), axis=1)

    pad = n_pad - n
    if pad:
        im = jnp.pad(im, ((0, pad), (0, 0)))
        s = jnp.pad(s, ((0, pad), (0, 0)))
        diag = jnp.pad(diag, (0, pad))
    dcol = diag.reshape(n_pad, 1)
    drow = diag.reshape(1, n_pad)

    n_i = n_pad // tm
    n_j = n_pad // tn
    grid = (n_i, n_j)

    in_specs = [
        pl.BlockSpec((tm, 1), lambda i, j: (i, 0)),   # diag, column view (d1)
        pl.BlockSpec((1, tn), lambda i, j: (0, j)),   # diag, row view    (d2)
        pl.BlockSpec((tm, d), lambda i, j: (i, 0)),   # im row tile
        pl.BlockSpec((tn, d), lambda i, j: (j, 0)),   # s  column tile
    ]
    compiler_params = pltpu.CompilerParams(
        dimension_semantics=("parallel", "arbitrary"))
    itemsize = jnp.dtype(im.dtype).itemsize
    cost = pl.CostEstimate(
        flops=2 * n_pad * n_pad * d,
        transcendentals=0,
        bytes_accessed=int(2 * n_pad * d * itemsize + 2 * n_pad * 4 + 8 * n_pad * 4))

    static = dict(margin=margin, n_valid=n, n_pad=n_pad, tm=tm, tn=tn)

    if not max_violation:
        row_part = pl.pallas_call(
            functools.partial(_vse_sum_kernel, **static),
            out_shape=jax.ShapeDtypeStruct((n_pad, 1), jnp.float32),
            grid_spec=pltpu.PrefetchScalarGridSpec(
                num_scalar_prefetch=0, grid=grid,
                in_specs=in_specs,
                out_specs=pl.BlockSpec((tm, 1), lambda i, j: (i, 0))),
            compiler_params=compiler_params,
            cost_estimate=cost,
        )(dcol, drow, im, s)
        # padded rows contribute exact zeros
        return jnp.sum(row_part)

    rmax_org, rmax_mix, cmax_org, cmax_mix = pl.pallas_call(
        functools.partial(_vse_max_kernel, **static),
        out_shape=(jax.ShapeDtypeStruct((n_pad, 1), jnp.float32),
                   jax.ShapeDtypeStruct((n_pad, 1), jnp.float32),
                   jax.ShapeDtypeStruct((n_i, 1, n_pad), jnp.float32),
                   jax.ShapeDtypeStruct((n_i, 1, n_pad), jnp.float32)),
        grid_spec=pltpu.PrefetchScalarGridSpec(
            num_scalar_prefetch=0, grid=grid,
            in_specs=in_specs,
            out_specs=(pl.BlockSpec((tm, 1), lambda i, j: (i, 0)),
                       pl.BlockSpec((tm, 1), lambda i, j: (i, 0)),
                       pl.BlockSpec((1, 1, tn), lambda i, j: (i, 0, j)),
                       pl.BlockSpec((1, 1, tn), lambda i, j: (i, 0, j)))),
        compiler_params=compiler_params,
        cost_estimate=cost,
    )(dcol, drow, im, s)
    # padded rows/columns produce exact zeros, so plain reductions are correct.
    return (jnp.sum(rmax_org) + jnp.sum(rmax_mix)
            + jnp.sum(jnp.max(cmax_org, axis=0))
            + jnp.sum(jnp.max(cmax_mix, axis=0)))


def _reference(im, s, lam1, lam2, margin=0.0, max_violation=False):
    """Pure-JAX line-by-line reproduction of the PyTorch forward (for verification)."""
    n = im.shape[0]
    scores = im @ s.T
    diag = jnp.diag(scores)[:, None]
    d1 = jnp.broadcast_to(diag, scores.shape)
    d2 = jnp.broadcast_to(diag.T, scores.shape)
    im_mix = lam1 * im + (1 - lam1) * s
    s_mix = lam2 * im + (1 - lam2) * s
    scores_mix = im_mix @ s_mix.T
    eye = jnp.eye(n, dtype=bool)
    scores = jnp.where(eye, jnp.diag(scores_mix)[:, None], scores)
    cost_s_mix = jnp.clip(margin / 2 + scores - d1, 0.0, None)
    cost_s_org = jnp.clip(margin + scores - d1, 0.0, None)
    cost_im_mix = jnp.clip(margin / 2 + scores - d2, 0.0, None)
    cost_im_org = jnp.clip(margin + scores - d2, 0.0, None)
    cost_s_mix = jnp.where(eye, 0.0, cost_s_mix)
    cost_s_org = jnp.where(eye, 0.0, cost_s_org)
    cost_im_mix = jnp.where(eye, 0.0, cost_im_mix)
    cost_im_org = jnp.where(eye, 0.0, cost_im_org)
    if max_violation:
        return (cost_s_mix.max(1).sum() + cost_im_mix.max(0).sum()
                + cost_s_org.max(1).sum() + cost_im_org.max(0).sum())
    return (cost_s_mix.sum() + cost_im_mix.sum()
            + cost_s_org.sum() + cost_im_org.sum())


if __name__ == "__main__":
    key = jax.random.PRNGKey(0)
    k_im, k_s, k_im2, k_s2, k_lam = jax.random.split(key, 5)

    # Deterministic stand-ins for np.random.beta(1.0, 1.0) (uniform on [0, 1]);
    # they provably do not change the forward value.
    lam1, lam2 = [float(x) for x in jax.random.uniform(k_lam, (2,))]

    def check(im, s, margin, max_violation):
        out = contrastive_loss_mixup(im, s, lam1, lam2, margin=margin,
                                     max_violation=max_violation)
        out = jax.block_until_ready(out)
        ref = _reference(im, s, lam1, lam2, margin=margin,
                         max_violation=max_violation)
        rel = abs(float(out) - float(ref)) / max(1.0, abs(float(ref)))
        assert rel < 1e-3, (margin, max_violation, float(out), float(ref))

    # small single-tile case (typical VSE batch shape, scaled down)
    N, D = 8, 32
    im = jax.random.normal(k_im, (N, D), dtype=jnp.float32)
    s = jax.random.normal(k_s, (N, D), dtype=jnp.float32)
    check(im, s, margin=0.0, max_violation=False)
    check(im, s, margin=0.2, max_violation=True)

    # multi-tile case exercising the (row, col) grid, accumulation and N padding
    N2, D2 = 200, 64
    im2 = jax.random.normal(k_im2, (N2, D2), dtype=jnp.float32)
    s2 = jax.random.normal(k_s2, (N2, D2), dtype=jnp.float32)
    check(im2, s2, margin=0.1, max_violation=False)
    check(im2, s2, margin=0.1, max_violation=True)

    print("KERNEL_OK")
</pallas_src>

<mosaic_0001>
module attributes {stable_mosaic.version = 11 : i64} {
  func.func @_vse_sum_kernel(%arg0: i32, %arg1: i32, %arg2: memref<8x1xf32, #tpu.memory_space<vmem>>, %arg3: memref<1x8xf32, #tpu.memory_space<vmem>>, %arg4: memref<8x32xf32, #tpu.memory_space<vmem>>, %arg5: memref<8x32xf32, #tpu.memory_space<vmem>>, %arg6: memref<8x1xf32, #tpu.memory_space<vmem>>) attributes {dimension_semantics = [#tpu.dimension_semantics<parallel>, #tpu.dimension_semantics<arbitrary>], iteration_bounds = array<i64: 1, 1>, scalar_prefetch = 0 : i64, scratch_operands = 0 : i64, tpu.core_type = #tpu.core_type<tc>, window_params = [{transform_indices = @transform_0, window_bounds = array<i64: 8, 1>}, {transform_indices = @transform_1, window_bounds = array<i64: 1, 8>}, {transform_indices = @transform_2, window_bounds = array<i64: 8, 32>}, {transform_indices = @transform_3, window_bounds = array<i64: 8, 32>}, {transform_indices = @transform_4, window_bounds = array<i64: 8, 1>}]} {
    %c0_i32 = arith.constant 0 : i32
    %0 = arith.cmpi eq, %arg1, %c0_i32 : i32
    %1 = arith.extui %0 : i1 to i32
    %c0_i32_0 = arith.constant 0 : i32
    %2 = arith.cmpi ne, %1, %c0_i32_0 : i32
    scf.if %2 {
      %cst_23 = arith.constant 0.000000e+00 : f32
      %47 = vector.broadcast %cst_23 : f32 to vector<8x1xf32>
      %c0_24 = arith.constant 0 : index
      %c0_25 = arith.constant 0 : index
      %48 = vector.load %arg6[%c0_24, %c0_25] : memref<8x1xf32, #tpu.memory_space<vmem>>, vector<8x1xf32>
      tpu.vector_store %arg6[%c0_24, %c0_25], %47 {strides = array<i32>} : memref<8x1xf32, #tpu.memory_space<vmem>>, vector<8x1xf32>,
    } else {
    }
    %c0 = arith.constant 0 : index
    %c0_1 = arith.constant 0 : index
    %3 = vector.load %arg4[%c0, %c0_1] : memref<8x32xf32, #tpu.memory_space<vmem>>, vector<8x32xf32>
    %c0_2 = arith.constant 0 : index
    %c0_3 = arith.constant 0 : index
    %4 = vector.load %arg5[%c0_2, %c0_3] : memref<8x32xf32, #tpu.memory_space<vmem>>, vector<8x32xf32>
    %cst = arith.constant dense<0.000000e+00> : vector<8x8xf32>
    %5 = tpu.matmul %3, %4, %cst {dimension_numbers = #tpu.dot_dimension_numbers<[1], [1], [0], [0], [0, 0, 1, 0], [], []>} : vector<8x32xf32>, vector<8x32xf32>, vector<8x8xf32> -> vector<8x8xf32>
    %c0_4 = arith.constant 0 : index
    %c0_5 = arith.constant 0 : index
    %6 = vector.load %arg2[%c0_4, %c0_5] : memref<8x1xf32, #tpu.memory_space<vmem>>, vector<8x1xf32>
    %7 = vector.broadcast %6 : vector<8x1xf32> to vector<8x8xf32>
    %8 = arith.subf %5, %7 : vector<8x8xf32>
    %c0_6 = arith.constant 0 : index
    %c0_7 = arith.constant 0 : index
    %9 = vector.load %arg3[%c0_6, %c0_7] : memref<1x8xf32, #tpu.memory_space<vmem>>, vector<1x8xf32>
    %10 = vector.broadcast %9 : vector<1x8xf32> to vector<8x8xf32>
    %11 = arith.subf %5, %10 : vector<8x8xf32>
    %c8_i32 = arith.constant 8 : i32
    %12 = arith.muli %arg0, %c8_i32 : i32
    %13 = tpu.iota {dimensions = array<i32: 0>} : vector<8x8xi32>
    %14 = vector.broadcast %12 : i32 to vector<8x8xi32>
    %15 = arith.addi %14, %13 : vector<8x8xi32>
    %c8_i32_8 = arith.constant 8 : i32
    %16 = arith.muli %arg1, %c8_i32_8 : i32
    %17 = tpu.iota {dimensions = array<i32: 1>} : vector<8x8xi32>
    %18 = vector.broadcast %16 : i32 to vector<8x8xi32>
    %19 = arith.addi %18, %17 : vector<8x8xi32>
    %20 = arith.cmpi eq, %15, %19 : vector<8x8xi32>
    %cst_9 = arith.constant 0.000000e+00 : f32
    %21 = vector.broadcast %cst_9 : f32 to vector<8x8xf32>
    %22 = arith.addf %8, %21 : vector<8x8xf32>
    %cst_10 = arith.constant 0.000000e+00 : f32
    %23 = vector.broadcast %cst_10 : f32 to vector<8x8xf32>
    %24 = arith.maximumf %22, %23 : vector<8x8xf32>
    %cst_11 = arith.constant 0.000000e+00 : f32
    %25 = vector.broadcast %cst_11 : f32 to vector<8x8xf32>
    %26 = arith.addf %8, %25 : vector<8x8xf32>
    %cst_12 = arith.constant 0.000000e+00 : f32
    %27 = vector.broadcast %cst_12 : f32 to vector<8x8xf32>
    %28 = arith.maximumf %26, %27 : vector<8x8xf32>
    %29 = arith.addf %24, %28 : vector<8x8xf32>
    %cst_13 = arith.constant 0.000000e+00 : f32
    %30 = vector.broadcast %cst_13 : f32 to vector<8x8xf32>
    %31 = arith.addf %11, %30 : vector<8x8xf32>
    %cst_14 = arith.constant 0.000000e+00 : f32
    %32 = vector.broadcast %cst_14 : f32 to vector<8x8xf32>
    %33 = arith.maximumf %31, %32 : vector<8x8xf32>
    %34 = arith.addf %29, %33 : vector<8x8xf32>
    %cst_15 = arith.constant 0.000000e+00 : f32
    %35 = vector.broadcast %cst_15 : f32 to vector<8x8xf32>
    %36 = arith.addf %11, %35 : vector<8x8xf32>
    %cst_16 = arith.constant 0.000000e+00 : f32
    %37 = vector.broadcast %cst_16 : f32 to vector<8x8xf32>
    %38 = arith.maximumf %36, %37 : vector<8x8xf32>
    %39 = arith.addf %34, %38 : vector<8x8xf32>
    %cst_17 = arith.constant 0.000000e+00 : f32
    %40 = vector.broadcast %cst_17 : f32 to vector<8x8xf32>
    %41 = arith.select %20, %40, %39 : vector<8x8xi1>, vector<8x8xf32>
    %c0_18 = arith.constant 0 : index
    %c0_19 = arith.constant 0 : index
    %42 = vector.load %arg6[%c0_18, %c0_19] : memref<8x1xf32, #tpu.memory_space<vmem>>, vector<8x1xf32>
    %cst_20 = arith.constant dense<0.000000e+00> : vector<8xf32>
    %43 = vector.multi_reduction <add>, %41, %cst_20 [1] : vector<8x8xf32> to vector<8xf32>
    %44 = vector.shape_cast %43 : vector<8xf32> to vector<8x1xf32>
    %45 = arith.addf %42, %44 : vector<8x1xf32>
    %c0_21 = arith.constant 0 : index
    %c0_22 = arith.constant 0 : index
    %46 = vector.load %arg6[%c0_21, %c0_22] : memref<8x1xf32, #tpu.memory_space<vmem>>, vector<8x1xf32>
    tpu.vector_store %arg6[%c0_21, %c0_22], %45 {strides = array<i32>} : memref<8x1xf32, #tpu.memory_space<vmem>>, vector<8x1xf32>,
    return
  }
  func.func @transform_0(%arg0: i32, %arg1: i32) -> (i32, i32) {
    %c0_i32 = arith.constant 0 : i32
    %c0_i32_0 = arith.constant 0 : i32
    return %arg0, %c0_i32 : i32, i32
  }
  func.func @transform_1(%arg0: i32, %arg1: i32) -> (i32, i32) {
    %c0_i32 = arith.constant 0 : i32
    %c0_i32_0 = arith.constant 0 : i32
    return %c0_i32, %arg1 : i32, i32
  }
  func.func @transform_2(%arg0: i32, %arg1: i32) -> (i32, i32) {
    %c0_i32 = arith.constant 0 : i32
    %c0_i32_0 = arith.constant 0 : i32
    return %arg0, %c0_i32 : i32, i32
  }
  func.func @transform_3(%arg0: i32, %arg1: i32) -> (i32, i32) {
    %c0_i32 = arith.constant 0 : i32
    %c0_i32_0 = arith.constant 0 : i32
    return %arg1, %c0_i32 : i32, i32
  }
  func.func @transform_4(%arg0: i32, %arg1: i32) -> (i32, i32) {
    %c0_i32 = arith.constant 0 : i32
    %c0_i32_0 = arith.constant 0 : i32
    return %arg0, %c0_i32 : i32, i32
  }
}

</mosaic_0001>

<bundles_post_ra>
// kernel: tpu_custom_call.1
= control target key start
LH: loop header
LB: loop body
LE: loop exit
PB: predicated region body
PF: predicated region fallthrough
CT: control target
= control target key end

     0   :  { %9 = vsyncpa [#allocation3], 0  ;;  %s198_s15 = smov [#allocation2]   ;;  %s250_s0 = inlined_call_operand.vmem [shape: f32[8,1], index: 0, kind: input, shape index: {}]   ;;  %s251_s1 = inlined_call_operand.vmem [shape: f32[1,8], index: 1, kind: input, shape index: {}]   ;;  %s252_s2 = inlined_call_operand.vmem [shape: f32[8,32], index: 2, kind: input, shape index: {}]   ;;  %s253_s3 = inlined_call_operand.hbm [shape: f32[8,32], index: 3, kind: input, shape index: {}]   ;;  %s254_s4 = inlined_call_operand.vmem [shape: f32[8,1], index: 4, kind: output, shape index: {}]  }
   0x1   :  { %s22_s16 = sshll.u32 %s198_s15, 4  ;;  %s23_s16 = int_to_ptr.vmem [resolvable:$true] %s22_s16 }
   0x2   :  { %s184_s17 = scalar_lea.vmem %s23_s16, 128  ;;  %p189_p1 = scmp.lt.s32.totalorder %s23_s16, %s23_s16 }
   0x3   :  { %p185_p0 = scmp.ne.s32.totalorder %s23_s16, %s184_s17  ;;  %p190_p2 = scmp.lt.s32.totalorder %s184_s17, %s184_s17 }
   0x5   :  { %p191_p3 = por %p190_p2, %p189_p1 }
   0x7   :  { %p192_p4 = pnand %p191_p3, %p185_p0 }
   0x9   :  { %195 = shalt.err (!%p192_p4)
}
   0xa   :  { %25 = dma.hbm_to_vmem [thread:$0]  %s253_s3, 128, %s23_s16, [#allocation3]  }
   0xb   :  { %196 = dma.done.wait [#allocation3], 128  }
   0xc   :  { %197 = vsyncadd [#allocation3], 4294967168  ;;  %vm33_vm0 = vcmask 7168   ;;  %v199_v0 = vmov 0.0   ;;  %vm200_vm1 = vmmov 0   ;;  %v201_v1 = vmov 0  }
   0xd   :  { %34 = vst.msk [vmem:[%s254_s4] sm:$0xff] %vm33_vm0, %v199_v0  ;;  %166 = vmatprep.subr.mxu0 %v199_v0  ;;  %168 = vmatprep.mubr.msk.f32.mxu0 %vm200_vm1, %v199_v0  ;;  %vm37_vm2 = vcmask 261120   ;;  %v36_v2 = vld [vmem:[#allocation2] sm:$0xff]  ;;  %v130_v8 = vlaneseq  ;;  %vm149_vm4 = vcmask 64512  }
   0xe   :  { %175 = vset.pattern.permute.xlu0 %v201_v1  ;;  %v114_v3 = vld [vmem:[%s250_s0] sm:$0xff]  ;;  %167 = vmatpush3.xpose.msk.msra.mxu0 %vm37_vm2, %v36_v2 }
   0xf   :  { %v35_v4 = vld [vmem:[%s252_s2] sm:$0xff]  ;;  %117 = vperm.xlu0 %175, %v114_v3   ;;  %v131_v13 = vshrl.u32 %v130_v8, 7  ;;  %v136_v14 = vand.u32 127, %v130_v8 }
  0x10   :  { %v163_v6 = vld [vmem:[%s251_s1] ss:$0 sm:$0xff] }
  0x11   :  { %169 = vmatmul.mubr.msk.f32.vlgmr.msra.gmra.mxu0 %vm37_vm2, %v35_v4  ;;  %vm139_vm3 = vcmp.eq.s32.totalorder %v131_v13, %v136_v14 }
  0x14   :  { %v148_v21 = vld [vmem:[%s254_s4] sm:$0xff] }
  0x8a   :  { %v118_v5 = vpop.permute.xlu0 %117 }
  0xd1   :  { %v110_v7 = vpop.f32.mrf.mxu0 }
  0xd2   :  { %v120_v9 = vsub.f32 %v110_v7, %v118_v5  ;;  %v128_v10 = vsub.f32 %v110_v7, %v163_v6 }
  0xd3   :  { %v170_v11 = vpop.f32.mrf.mxu0 }
  0xd4   :  { %v141_v12 = vmax.f32 %v120_v9, 0.0  ;;  %v144_v16 = vmax.f32 %v128_v10, 0.0 }
  0xd6   :  { %v142_v15 = vadd.f32 %v141_v12, %v141_v12 }
  0xd8   :  { %v145_v17 = vadd.f32 %v144_v16, %v142_v15 }
  0xda   :  { %v146_v18 = vadd.f32 %v145_v17, %v144_v16 }
  0xdc   :  { %v147_v19 = vsel %vm139_vm3, 0.0, %v146_v18 }
  0xdd   :  { %v150_v20 = vsel %vm149_vm4, %v147_v19, 0.0 }
  0xde   :  { %151 = vadd.xlane.f32.xlu0 %v150_v20 }
 0x167   :  { %v152_v22 = vpop.xlane.xlu0 %151 }
 0x168   :  { %v153_v23 = vadd.f32 %v152_v22, %v148_v21 }
 0x16a   :  { %155 = vst.msk [vmem:[%s254_s4] sm:$0xff] %vm33_vm0, %v153_v23 }
 0x16b   :  { %160 = vsyncpa [#allocation3], 1 }

</bundles_post_ra>
